<compile_context>
chip_gen: v7x
topology: tpu7x:2x2x1
jax: 0.10.0
libtpu: 0.0.40
codegen_flags: <defaults>
</compile_context>

<pallas_src>
import functools

import jax
import jax.numpy as jnp
from jax.experimental import pallas as pl
from jax.experimental.pallas import tpu as pltpu

H1 = 128      # fc1 width
H2 = 256      # fc2 width
N_PAD = 128   # lane-dense padded output width (>= n_actions)


def _round_up(a, m):
    return ((a + m - 1) // m) * m


def _mlp_kernel(x_ref, w1_ref, b1_ref, w2_ref, b2_ref, w3_ref, b3_ref, o_ref):
    in_dim = x_ref.shape[1]
    x = x_ref[...]                                   # (tb, in_dim) f32
    w1 = w1_ref[...]                                 # (in_dim, H1) f32

    # fc1 + relu: tiny contraction dim -> unrolled VPU broadcast-FMAs in f32
    # (avoids a zero-padded K=128 MXU pass; exact f32 math for this layer).
    h1 = x[:, 0:1] * w1[0:1, :] + b1_ref[...]
    for k in range(1, in_dim):                       # static, unrolled (~4)
        h1 = h1 + x[:, k:k + 1] * w1[k:k + 1, :]
    h1 = jnp.maximum(h1, 0.0)

    # fc2 + relu: bf16 MXU operands, f32 accumulation / elementwise.
    h2 = jnp.dot(h1.astype(jnp.bfloat16), w2_ref[...],
                 preferred_element_type=jnp.float32)
    h2 = jnp.maximum(h2 + b2_ref[...], 0.0)

    # fc3 (no activation).
    out = jnp.dot(h2.astype(jnp.bfloat16), w3_ref[...],
                  preferred_element_type=jnp.float32) + b3_ref[...]
    o_ref[...] = out.astype(o_ref.dtype)             # lane-dense bf16 store


def prepare_packed_params(params):
    """One-time weight packing (pad/cast), hoisted out of the forward path."""
    def row(b):
        return jnp.asarray(b).reshape(1, -1)         # accept 1-D or (1, n) bias

    w1 = jnp.asarray(params["w1"], jnp.float32)      # (in_dim, H1)
    w2 = jnp.asarray(params["w2"])
    w3 = jnp.asarray(params["w3"])
    n_actions = w3.shape[1]
    assert w1.shape[1] == H1 and w2.shape == (H1, H2) and w3.shape[0] == H2
    assert n_actions <= N_PAD
    packed = {
        "w1": w1,
        "b1": row(params["b1"]).astype(jnp.float32),
        "w2": w2.astype(jnp.bfloat16),
        "b2": row(params["b2"]).astype(jnp.float32),
        "w3": jnp.pad(w3, ((0, 0), (0, N_PAD - n_actions))).astype(jnp.bfloat16),
        "b3": jnp.pad(row(params["b3"]),
                      ((0, 0), (0, N_PAD - n_actions))).astype(jnp.float32),
    }
    return packed, n_actions


@functools.partial(jax.jit, static_argnames=("n_actions", "block_b"))
def deep_cartpole_balancer_forward(x, packed, *, n_actions, block_b=1024):
    """x: (B, in_dim) float32. packed: output of prepare_packed_params()."""
    w1, b1, w2, b2, w3, b3 = (packed["w1"], packed["b1"], packed["w2"],
                              packed["b2"], packed["w3"], packed["b3"])
    B, in_dim = x.shape
    assert w1.shape == (in_dim, H1)

    # Batch tile: multiple of 16 (bf16 output sublane packing).  When the batch
    # is big enough, keep >= 2 grid steps so the "parallel" axis can shard
    # across both TensorCores on v7x.  VMEM at tb<=2048 is ~4 MiB: far under
    # every generation's scoped limit, so no vmem_limit_bytes override needed.
    b16 = _round_up(B, 16)
    tb = min(_round_up(block_b, 16), b16)
    if b16 >= 32:
        tb = min(tb, _round_up(pl.cdiv(b16, 2), 16))
    b_pad = _round_up(b16, tb)
    grid = (b_pad // tb,)

    if b_pad != B:
        x = jnp.pad(x, ((0, b_pad - B), (0, 0)))
    x = x.astype(jnp.float32)

    resident = lambda shape: pl.BlockSpec(shape, lambda i: (0, 0))

    flops = 2 * b_pad * (in_dim * H1 + H1 * H2 + H2 * N_PAD)
    bytes_accessed = (
        b_pad * in_dim * 4 + b_pad * N_PAD * 2       # x in (f32), out (bf16)
        + w1.size * 4 + b1.size * 4                  # f32 fc1 params
        + w2.size * 2 + b2.size * 4
        + w3.size * 2 + b3.size * 4
    )

    out_padded = pl.pallas_call(
        _mlp_kernel,
        out_shape=jax.ShapeDtypeStruct((b_pad, N_PAD), jnp.bfloat16),
        grid_spec=pltpu.PrefetchScalarGridSpec(
            num_scalar_prefetch=0,
            grid=grid,
            in_specs=[
                pl.BlockSpec((tb, in_dim), lambda i: (i, 0)),  # x tile (unpadded K)
                resident((in_dim, H1)),                        # w1 (VMEM-resident)
                resident((1, H1)),                             # b1
                resident((H1, H2)),                            # w2
                resident((1, H2)),                             # b2
                resident((H2, N_PAD)),                         # w3 (padded cols)
                resident((1, N_PAD)),                          # b3 (padded cols)
            ],
            out_specs=pl.BlockSpec((tb, N_PAD), lambda i: (i, 0)),
        ),
        compiler_params=pltpu.CompilerParams(
            dimension_semantics=("parallel",),
        ),
        cost_estimate=pl.CostEstimate(
            flops=flops, transcendentals=0, bytes_accessed=bytes_accessed),
    )(x, w1, b1, w2, b2, w3, b3)

    # Slice back to the true (B, n_actions) result, restore f32.
    return out_padded[:B, :n_actions].astype(jnp.float32)
    # TODO(synk): for an RL step-loop with B~8, batch environment steps or keep
    # the ~160 KB of weights resident across calls (cross-call prefetch, P10);
    # per-call launch + weight DMA dominates at that size.


def init_params(key, in_dim, n_actions):
    """Deterministic synthetic init (PyTorch-Linear-style uniform bounds)."""
    ks = jax.random.split(key, 6)

    def lin(kw, kb, fan_in, fan_out):
        bound = 1.0 / jnp.sqrt(jnp.float32(fan_in))
        w = jax.random.uniform(kw, (fan_in, fan_out), jnp.float32, -bound, bound)
        b = jax.random.uniform(kb, (1, fan_out), jnp.float32, -bound, bound)
        return w, b

    w1, b1 = lin(ks[0], ks[1], in_dim, H1)
    w2, b2 = lin(ks[2], ks[3], H1, H2)
    w3, b3 = lin(ks[4], ks[5], H2, n_actions)
    return {"w1": w1, "b1": b1, "w2": w2, "b2": b2, "w3": w3, "b3": b3}


def _reference(x, p):
    h1 = jnp.maximum(x @ p["w1"] + p["b1"], 0.0)
    h2 = jnp.maximum(h1 @ p["w2"] + p["b2"], 0.0)
    return h2 @ p["w3"] + p["b3"]


if __name__ == "__main__":
    key = jax.random.PRNGKey(0)
    k_x, k_x2, k_p = jax.random.split(key, 3)

    in_dim, n_actions = 4, 2  # CartPole: 4-dim state, 2 actions
    params = init_params(k_p, in_dim, n_actions)
    packed, n_act = prepare_packed_params(params)    # one-time weight packing

    # Small serving-style batch (grid = 1).
    x = jax.random.normal(k_x, (8, in_dim), jnp.float32)
    out = jax.block_until_ready(
        deep_cartpole_balancer_forward(x, packed, n_actions=n_act))
    ref = _reference(x, params)
    assert out.shape == (8, n_actions)
    assert jnp.allclose(out, ref, atol=3e-2, rtol=3e-2), (
        float(jnp.max(jnp.abs(out - ref))))

    # Larger batch exercising the >=2-step parallel grid and batch padding.
    x2 = jax.random.normal(k_x2, (48, in_dim), jnp.float32)
    out2 = jax.block_until_ready(
        deep_cartpole_balancer_forward(x2, packed, n_actions=n_act))
    ref2 = _reference(x2, params)
    assert out2.shape == (48, n_actions)
    assert jnp.allclose(out2, ref2, atol=3e-2, rtol=3e-2), (
        float(jnp.max(jnp.abs(out2 - ref2))))

    print("KERNEL_OK")
</pallas_src>

<mosaic_0001>
module attributes {stable_mosaic.version = 11 : i64} {
  func.func @_mlp_kernel(%arg0: i32, %arg1: memref<16x4xf32, #tpu.memory_space<vmem>>, %arg2: memref<4x128xf32, #tpu.memory_space<vmem>>, %arg3: memref<1x128xf32, #tpu.memory_space<vmem>>, %arg4: memref<128x256xbf16, #tpu.memory_space<vmem>>, %arg5: memref<1x256xf32, #tpu.memory_space<vmem>>, %arg6: memref<256x128xbf16, #tpu.memory_space<vmem>>, %arg7: memref<1x128xf32, #tpu.memory_space<vmem>>, %arg8: memref<16x128xbf16, #tpu.memory_space<vmem>>) attributes {dimension_semantics = [#tpu.dimension_semantics<parallel>], iteration_bounds = array<i64: 1>, scalar_prefetch = 0 : i64, scratch_operands = 0 : i64, tpu.core_type = #tpu.core_type<tc>, window_params = [{transform_indices = @transform_0, window_bounds = array<i64: 16, 4>}, {pipeline_mode = #tpu.pipeline_mode<synchronous>, transform_indices = @transform_1, window_bounds = array<i64: 4, 128>}, {pipeline_mode = #tpu.pipeline_mode<synchronous>, transform_indices = @transform_2, window_bounds = array<i64: 1, 128>}, {pipeline_mode = #tpu.pipeline_mode<synchronous>, transform_indices = @transform_3, window_bounds = array<i64: 128, 256>}, {pipeline_mode = #tpu.pipeline_mode<synchronous>, transform_indices = @transform_4, window_bounds = array<i64: 1, 256>}, {pipeline_mode = #tpu.pipeline_mode<synchronous>, transform_indices = @transform_5, window_bounds = array<i64: 256, 128>}, {pipeline_mode = #tpu.pipeline_mode<synchronous>, transform_indices = @transform_6, window_bounds = array<i64: 1, 128>}, {transform_indices = @transform_7, window_bounds = array<i64: 16, 128>}]} {
    %c0 = arith.constant 0 : index
    %c0_0 = arith.constant 0 : index
    %0 = vector.load %arg1[%c0, %c0_0] : memref<16x4xf32, #tpu.memory_space<vmem>>, vector<16x4xf32>
    %c0_1 = arith.constant 0 : index
    %c0_2 = arith.constant 0 : index
    %1 = vector.load %arg2[%c0_1, %c0_2] : memref<4x128xf32, #tpu.memory_space<vmem>>, vector<4x128xf32>
    %2 = vector.extract_strided_slice %0 {offsets = [0, 0], sizes = [16, 1], strides = [1, 1]} : vector<16x4xf32> to vector<16x1xf32>
    %3 = vector.extract_strided_slice %1 {offsets = [0, 0], sizes = [1, 128], strides = [1, 1]} : vector<4x128xf32> to vector<1x128xf32>
    %4 = vector.broadcast %2 : vector<16x1xf32> to vector<16x128xf32>
    %5 = vector.broadcast %3 : vector<1x128xf32> to vector<16x128xf32>
    %6 = arith.mulf %4, %5 : vector<16x128xf32>
    %c0_3 = arith.constant 0 : index
    %c0_4 = arith.constant 0 : index
    %7 = vector.load %arg3[%c0_3, %c0_4] : memref<1x128xf32, #tpu.memory_space<vmem>>, vector<1x128xf32>
    %8 = vector.broadcast %7 : vector<1x128xf32> to vector<16x128xf32>
    %9 = arith.addf %6, %8 : vector<16x128xf32>
    %10 = vector.extract_strided_slice %0 {offsets = [0, 1], sizes = [16, 1], strides = [1, 1]} : vector<16x4xf32> to vector<16x1xf32>
    %11 = vector.extract_strided_slice %1 {offsets = [1, 0], sizes = [1, 128], strides = [1, 1]} : vector<4x128xf32> to vector<1x128xf32>
    %12 = vector.broadcast %10 : vector<16x1xf32> to vector<16x128xf32>
    %13 = vector.broadcast %11 : vector<1x128xf32> to vector<16x128xf32>
    %14 = arith.mulf %12, %13 : vector<16x128xf32>
    %15 = arith.addf %9, %14 : vector<16x128xf32>
    %16 = vector.extract_strided_slice %0 {offsets = [0, 2], sizes = [16, 1], strides = [1, 1]} : vector<16x4xf32> to vector<16x1xf32>
    %17 = vector.extract_strided_slice %1 {offsets = [2, 0], sizes = [1, 128], strides = [1, 1]} : vector<4x128xf32> to vector<1x128xf32>
    %18 = vector.broadcast %16 : vector<16x1xf32> to vector<16x128xf32>
    %19 = vector.broadcast %17 : vector<1x128xf32> to vector<16x128xf32>
    %20 = arith.mulf %18, %19 : vector<16x128xf32>
    %21 = arith.addf %15, %20 : vector<16x128xf32>
    %22 = vector.extract_strided_slice %0 {offsets = [0, 3], sizes = [16, 1], strides = [1, 1]} : vector<16x4xf32> to vector<16x1xf32>
    %23 = vector.extract_strided_slice %1 {offsets = [3, 0], sizes = [1, 128], strides = [1, 1]} : vector<4x128xf32> to vector<1x128xf32>
    %24 = vector.broadcast %22 : vector<16x1xf32> to vector<16x128xf32>
    %25 = vector.broadcast %23 : vector<1x128xf32> to vector<16x128xf32>
    %26 = arith.mulf %24, %25 : vector<16x128xf32>
    %27 = arith.addf %21, %26 : vector<16x128xf32>
    %cst = arith.constant 0.000000e+00 : f32
    %28 = vector.broadcast %cst : f32 to vector<16x128xf32>
    %29 = arith.maximumf %27, %28 : vector<16x128xf32>
    %30 = arith.truncf %29 : vector<16x128xf32> to vector<16x128xbf16>
    %c0_5 = arith.constant 0 : index
    %c0_6 = arith.constant 0 : index
    %31 = vector.load %arg4[%c0_5, %c0_6] : memref<128x256xbf16, #tpu.memory_space<vmem>>, vector<128x256xbf16>
    %cst_7 = arith.constant dense<0.000000e+00> : vector<16x256xf32>
    %32 = tpu.matmul %30, %31, %cst_7 {dimension_numbers = #tpu.dot_dimension_numbers<[1], [0], [0], [1], [0, 0, 1, 1], [], []>} : vector<16x128xbf16>, vector<128x256xbf16>, vector<16x256xf32> -> vector<16x256xf32>
    %c0_8 = arith.constant 0 : index
    %c0_9 = arith.constant 0 : index
    %33 = vector.load %arg5[%c0_8, %c0_9] : memref<1x256xf32, #tpu.memory_space<vmem>>, vector<1x256xf32>
    %34 = vector.broadcast %33 : vector<1x256xf32> to vector<16x256xf32>
    %35 = arith.addf %32, %34 : vector<16x256xf32>
    %cst_10 = arith.constant 0.000000e+00 : f32
    %36 = vector.broadcast %cst_10 : f32 to vector<16x256xf32>
    %37 = arith.maximumf %35, %36 : vector<16x256xf32>
    %38 = arith.truncf %37 : vector<16x256xf32> to vector<16x256xbf16>
    %c0_11 = arith.constant 0 : index
    %c0_12 = arith.constant 0 : index
    %39 = vector.load %arg6[%c0_11, %c0_12] : memref<256x128xbf16, #tpu.memory_space<vmem>>, vector<256x128xbf16>
    %cst_13 = arith.constant dense<0.000000e+00> : vector<16x128xf32>
    %40 = tpu.matmul %38, %39, %cst_13 {dimension_numbers = #tpu.dot_dimension_numbers<[1], [0], [0], [1], [0, 0, 1, 1], [], []>} : vector<16x256xbf16>, vector<256x128xbf16>, vector<16x128xf32> -> vector<16x128xf32>
    %c0_14 = arith.constant 0 : index
    %c0_15 = arith.constant 0 : index
    %41 = vector.load %arg7[%c0_14, %c0_15] : memref<1x128xf32, #tpu.memory_space<vmem>>, vector<1x128xf32>
    %42 = vector.broadcast %41 : vector<1x128xf32> to vector<16x128xf32>
    %43 = arith.addf %40, %42 : vector<16x128xf32>
    %44 = arith.truncf %43 : vector<16x128xf32> to vector<16x128xbf16>
    %c0_16 = arith.constant 0 : index
    %c0_17 = arith.constant 0 : index
    %45 = vector.load %arg8[%c0_16, %c0_17] : memref<16x128xbf16, #tpu.memory_space<vmem>>, vector<16x128xbf16>
    tpu.vector_store %arg8[%c0_16, %c0_17], %44 {strides = array<i32>} : memref<16x128xbf16, #tpu.memory_space<vmem>>, vector<16x128xbf16>,
    return
  }
  func.func @transform_0(%arg0: i32) -> (i32, i32) {
    %c0_i32 = arith.constant 0 : i32
    %c0_i32_0 = arith.constant 0 : i32
    return %arg0, %c0_i32 : i32, i32
  }
  func.func @transform_1(%arg0: i32) -> (i32, i32) {
    %c0_i32 = arith.constant 0 : i32
    %c0_i32_0 = arith.constant 0 : i32
    %c0_i32_1 = arith.constant 0 : i32
    return %c0_i32, %c0_i32_0 : i32, i32
  }
  func.func @transform_2(%arg0: i32) -> (i32, i32) {
    %c0_i32 = arith.constant 0 : i32
    %c0_i32_0 = arith.constant 0 : i32
    %c0_i32_1 = arith.constant 0 : i32
    return %c0_i32, %c0_i32_0 : i32, i32
  }
  func.func @transform_3(%arg0: i32) -> (i32, i32) {
    %c0_i32 = arith.constant 0 : i32
    %c0_i32_0 = arith.constant 0 : i32
    %c0_i32_1 = arith.constant 0 : i32
    return %c0_i32, %c0_i32_0 : i32, i32
  }
  func.func @transform_4(%arg0: i32) -> (i32, i32) {
    %c0_i32 = arith.constant 0 : i32
    %c0_i32_0 = arith.constant 0 : i32
    %c0_i32_1 = arith.constant 0 : i32
    return %c0_i32, %c0_i32_0 : i32, i32
  }
  func.func @transform_5(%arg0: i32) -> (i32, i32) {
    %c0_i32 = arith.constant 0 : i32
    %c0_i32_0 = arith.constant 0 : i32
    %c0_i32_1 = arith.constant 0 : i32
    return %c0_i32, %c0_i32_0 : i32, i32
  }
  func.func @transform_6(%arg0: i32) -> (i32, i32) {
    %c0_i32 = arith.constant 0 : i32
    %c0_i32_0 = arith.constant 0 : i32
    %c0_i32_1 = arith.constant 0 : i32
    return %c0_i32, %c0_i32_0 : i32, i32
  }
  func.func @transform_7(%arg0: i32) -> (i32, i32) {
    %c0_i32 = arith.constant 0 : i32
    %c0_i32_0 = arith.constant 0 : i32
    return %arg0, %c0_i32 : i32, i32
  }
}

</mosaic_0001>

<bundles_post_ra>
// kernel: deep_cartpole_balancer_forward.1
= control target key start
LH: loop header
LB: loop body
LE: loop exit
PB: predicated region body
PF: predicated region fallthrough
CT: control target
= control target key end

     0   :  { %12 = vsyncpa [#allocation3], 0  ;;  %s747_s0 = inlined_call_operand.vmem [shape: f32[16,4], index: 0, kind: input, shape index: {}]   ;;  %s748_s1 = inlined_call_operand.vmem [shape: f32[4,128], index: 1, kind: input, shape index: {}]   ;;  %s749_s2 = inlined_call_operand.vmem [shape: f32[1,128], index: 2, kind: input, shape index: {}]   ;;  %s750_s3 = inlined_call_operand.hbm [shape: bf16[128,256], index: 3, kind: input, shape index: {}]   ;;  %s751_s4 = inlined_call_operand.vmem [shape: f32[1,256], index: 4, kind: input, shape index: {}]   ;;  %s752_s5 = inlined_call_operand.hbm [shape: bf16[256,128], index: 5, kind: input, shape index: {}]   ;;  %s753_s6 = inlined_call_operand.vmem [shape: f32[1,128], index: 6, kind: input, shape index: {}]   ;;  %s754_s7 = inlined_call_operand.vmem [shape: bf16[16,128], index: 7, kind: output, shape index: {}]  }
   0x1   :  { %13 = vsyncpa [#allocation5], 0  ;;  %s652_s24 = smov [#allocation2]   ;;  %s604_s28 = scalar_lea.hbm %s750_s3, 2048 }
   0x2   :  { %s25_s25 = sshll.u32 %s652_s24, 4  ;;  %p605_p0 = scmp.ne.s32.totalorder %s750_s3, %s604_s28  ;;  %s26_s25 = int_to_ptr.vmem [resolvable:$true] %s25_s25 }
   0x3   :  { %p608_p1 = scmp.lt.u32.totalorder %s604_s28, %s750_s3 }
   0x5   :  { %p610_p2 = pnand %p608_p1, %p605_p0 }
   0x7   :  { %613 = shalt.err (!%p610_p2)
}
   0x8   :  { %s614_s10 = scalar_lea.vmem %s26_s25, 2048  ;;  %p619_p4 = scmp.lt.s32.totalorder %s26_s25, %s26_s25 }
   0x9   :  { %p615_p3 = scmp.ne.s32.totalorder %s26_s25, %s614_s10  ;;  %p620_p5 = scmp.lt.s32.totalorder %s614_s10, %s614_s10 }
   0xb   :  { %p621_p6 = por %p620_p5, %p619_p4 }
   0xd   :  { %p622_p7 = pnand %p621_p6, %p615_p3 }
   0xf   :  { %625 = shalt.err (!%p622_p7)
}
  0x10   :  { %s653_s11 = smov 128   ;;  %s654_s12 = smov 8  }
  0x11   :  { %31 = dma.hbm_to_vmem [thread:$0]  %s750_s3, 2048, %s26_s25, [#allocation3], %s653_s11, %s653_s11, %s654_s12  }
  0x12   :  { %s655_s15 = smov [#allocation4]   ;;  %s626_s19 = scalar_lea.hbm %s752_s5, 2048 }
  0x13   :  { %s39_s16 = sshll.u32 %s655_s15, 4  ;;  %p627_p8 = scmp.ne.s32.totalorder %s752_s5, %s626_s19  ;;  %s40_s16 = int_to_ptr.vmem [resolvable:$true] %s39_s16 }
  0x14   :  { %p630_p9 = scmp.lt.u32.totalorder %s626_s19, %s752_s5 }
  0x16   :  { %p632_p10 = pnand %p630_p9, %p627_p8 }
  0x18   :  { %635 = shalt.err (!%p632_p10)
}
  0x19   :  { %s636_s24 = scalar_lea.vmem %s40_s16, 2048  ;;  %p641_p12 = scmp.lt.s32.totalorder %s40_s16, %s40_s16 }
  0x1a   :  { %p637_p11 = scmp.ne.s32.totalorder %s40_s16, %s636_s24  ;;  %p642_p13 = scmp.lt.s32.totalorder %s636_s24, %s636_s24 }
  0x1c   :  { %p643_p0 = por %p642_p13, %p641_p12 }
  0x1e   :  { %p644_p1 = pnand %p643_p0, %p637_p11 }
  0x20   :  { %647 = shalt.err (!%p644_p1)
}
  0x21   :  { %s656_s3 = smov 64   ;;  %s657_s25 = smov 4  }
  0x22   :  { %45 = dma.hbm_to_vmem [thread:$0]  %s752_s5, 2048, %s40_s16, [#allocation5], %s656_s3, %s656_s3, %s657_s25  }
  0x23   :  { %648 = dma.done.wait [#allocation3], 2048  }
  0x24   :  { %649 = vsyncadd [#allocation3], 4294965248 }
  0x25   :  { %650 = dma.done.wait [#allocation5], 2048  }
  0x26   :  { %651 = vsyncadd [#allocation5], 4294965248  ;;  %v658_v0 = vmov 1   ;;  %v659_v1 = vmov 0   ;;  %v55_v2 = vld [vmem:[%s747_s0] sm:$0xff]  ;;  %v56_v3 = vld [vmem:[%s747_s0 + $0x8] sm:$0xff]  ;;  %v68_v33 = vlaneseq }
  0x27   :  { %559 = vset.pattern.permute.xlu1 %v658_v0  ;;  %558 = vset.pattern.permute.xlu0 %v659_v1  ;;  %v564_v4 = vld [vmem:[#allocation2 + $0x4] ss:$8 sps:$4 sm:$0xff]   ;;  %v566_v5 = vld [vmem:[#allocation2] ss:$8 sps:$4 sm:$0xff]   ;;  %v567_v6 = vld [vmem:[#allocation2 + $0x14] ss:$8 sps:$4 sm:$0xff]  }
  0x28   :  { %274 = vmatprep.mubr.bf16.mxu0 %v659_v1  ;;  %84 = vperm.xlu1 %559, %v55_v2   ;;  %v569_v7 = vld [vmem:[#allocation2 + $0x10] ss:$8 sps:$4 sm:$0xff]   ;;  %v570_v8 = vld [vmem:[#allocation2 + $0x24] ss:$8 sps:$4 sm:$0xff]   ;;  %v572_v9 = vld [vmem:[#allocation2 + $0x20] ss:$8 sps:$4 sm:$0xff]  }
  0x29   :  { %60 = vperm.xlu0 %558, %v55_v2   ;;  %242 = vmatprep.subr.bf16.mxu0 %v564_v4  ;;  %v660_v10 = vmov 2   ;;  %v573_v11 = vld [vmem:[#allocation2 + $0x34] ss:$8 sps:$4 sm:$0xff]   ;;  %v575_v12 = vld [vmem:[#allocation2 + $0x30] ss:$8 sps:$4 sm:$0xff]   ;;  %v661_v14 = vmov 3  }
  0x2a   :  { %243 = vmatpush1.bf16.msra.mxu0 %v566_v5  ;;  %v576_v13 = vld [vmem:[#allocation2 + $0x44] ss:$8 sps:$4 sm:$0xff]   ;;  %v578_v15 = vld [vmem:[#allocation2 + $0x40] ss:$8 sps:$4 sm:$0xff]   ;;  %v579_v16 = vld [vmem:[#allocation2 + $0x54] ss:$8 sps:$4 sm:$0xff]  }
  0x2b   :  { %244 = vmatprep.subr.bf16.mxu0 %v567_v6  ;;  %v581_v17 = vld [vmem:[#allocation2 + $0x50] ss:$8 sps:$4 sm:$0xff]   ;;  %v582_v18 = vld [vmem:[#allocation2 + $0x64] ss:$8 sps:$4 sm:$0xff]   ;;  %v584_v22 = vld [vmem:[#allocation2 + $0x60] ss:$8 sps:$4 sm:$0xff]  }
  0x2c   :  { %88 = vperm.xlu1 %559, %v56_v3   ;;  %v588_v19 = vld [vmem:[#allocation4 + $0x40] sm:$0xff]   ;;  %v590_v21 = vld [vmem:[#allocation4 + $0x48] sm:$0xff]   ;;  %v585_v23 = vld [vmem:[#allocation2 + $0x74] ss:$8 sps:$4 sm:$0xff]   ;;  %v69_v34 = vshrl.u32 %v68_v33, 7 }
  0x2d   :  { %65 = vperm.xlu0 %558, %v56_v3   ;;  %v589_v20 = vld [vmem:[#allocation4] sm:$0xff]   ;;  %526 = vmatprep.subr.bf16.mxu1 %v588_v19  ;;  %v591_v24 = vld [vmem:[#allocation4 + $0x8] sm:$0xff]   ;;  %v592_v25 = vld [vmem:[#allocation4 + $0x50] sm:$0xff]  }
  0x2e   :  { %245 = vmatpush1.bf16.msra.mxu0 %v569_v7  ;;  %527 = vmatpush3.bf16.msra.mxu1 %v589_v20  ;;  %v587_v26 = vld [vmem:[#allocation2 + $0x70] ss:$8 sps:$4 sm:$0xff]   ;;  %v596_v30 = vld [vmem:[#allocation4 + $0x60] sm:$0xff]   ;;  %v598_v32 = vld [vmem:[#allocation4 + $0x68] sm:$0xff]   ;;  %v70_v35 = vsub.s32 0, %v69_v34  ;;  %v93_v40 = vsub.s32 1, %v69_v34 }
  0x2f   :  { %246 = vmatprep.subr.bf16.mxu0 %v570_v8  ;;  %528 = vmatprep.subr.bf16.mxu1 %v590_v21  ;;  %v593_v27 = vld [vmem:[#allocation4 + $0x10] sm:$0xff]   ;;  %v594_v28 = vld [vmem:[#allocation4 + $0x58] sm:$0xff]   ;;  %v597_v31 = vld [vmem:[#allocation4 + $0x20] sm:$0xff]   ;;  %v109_v41 = vsub.s32 2, %v69_v34  ;;  %v125_v47 = vsub.s32 3, %v69_v34 }
  0x30   :  { %561 = vset.pattern.permute.xlu1 %v660_v10  ;;  %v595_v29 = vld [vmem:[#allocation4 + $0x18] sm:$0xff]   ;;  %v57_v36 = vld [vmem:[%s748_s1] sm:$0xf]  ;;  %v599_v8 = vld [vmem:[#allocation4 + $0x28] sm:$0xff]  }
  0x31   :  { %560 = vset.pattern.permute.xlu0 %v660_v10  ;;  %104 = vperm.xlu1 %561, %v56_v3   ;;  %v71_v39 = vrot.slane %v57_v36, %v70_v35  ;;  %v483_v46 = vld [vmem:[%s749_s2] ss:$0 sm:$0xff]  ;;  %v94_v48 = vrot.slane %v57_v36, %v93_v40  ;;  %v110_v50 = vrot.slane %v57_v36, %v109_v41  ;;  %v601_v10 = vld [vmem:[#allocation4 + $0x30] sm:$0xff]  }
  0x32   :  { %100 = vperm.xlu0 %560, %v55_v2   ;;  %247 = vmatpush1.bf16.msra.mxu0 %v572_v9  ;;  %v126_v55 = vrot.slane %v57_v36, %v125_v47  ;;  %v600_v9 = vld [vmem:[#allocation4 + $0x70] sm:$0xff]   ;;  %v500_v34 = vld [vmem:[%s753_s6] ss:$0 sm:$0xff] }
  0x33   :  { %248 = vmatprep.subr.bf16.mxu0 %v573_v11  ;;  %529 = vmatpush3.bf16.msra.mxu1 %v591_v24  ;;  %v602_v11 = vld [vmem:[#allocation4 + $0x78] sm:$0xff]  }
  0x34   :  { %530 = vmatprep.subr.bf16.mxu1 %v592_v25 }
  0x35   :  { %562 = vset.pattern.permute.xlu1 %v661_v14 }
  0x36   :  { %563 = vset.pattern.permute.xlu0 %v661_v14  ;;  %116 = vperm.xlu1 %562, %v55_v2  }
  0x37   :  { %120 = vperm.xlu0 %563, %v56_v3   ;;  %249 = vmatpush1.bf16.msra.mxu0 %v575_v12  ;;  %v603_v12 = vld [vmem:[#allocation4 + $0x38] sm:$0xff]  }
  0x38   :  { %250 = vmatprep.subr.bf16.mxu0 %v576_v13  ;;  %531 = vmatpush3.bf16.msra.mxu1 %v593_v27  ;;  %v150_v13 = vld [vmem:[%s751_s4] sm:$0x3] }
  0x39   :  { %532 = vmatprep.subr.bf16.mxu1 %v594_v28  ;;  %v155_v14 = vrot.slane %v150_v13, %v70_v35 }
  0x3b   :  { %251 = vmatpush1.bf16.msra.mxu0 %v578_v15  ;;  %v159_v15 = vrot.slane %v150_v13, %v93_v40 }
  0x3c   :  { %252 = vmatprep.subr.bf16.mxu0 %v579_v16  ;;  %533 = vmatpush3.bf16.msra.mxu1 %v595_v29 }
  0x3d   :  { %534 = vmatprep.subr.bf16.mxu1 %v596_v30 }
  0x3f   :  { %253 = vmatpush1.bf16.msra.mxu0 %v581_v17 }
  0x40   :  { %254 = vmatprep.subr.bf16.mxu0 %v582_v18  ;;  %535 = vmatpush3.bf16.msra.mxu1 %v597_v31 }
  0x41   :  { %536 = vmatprep.subr.bf16.mxu1 %v598_v32 }
  0x43   :  { %255 = vmatpush1.bf16.msra.mxu0 %v584_v22 }
  0x44   :  { %256 = vmatprep.subr.bf16.mxu0 %v585_v23  ;;  %537 = vmatpush3.bf16.msra.mxu1 %v599_v8 }
  0x45   :  { %538 = vmatprep.subr.bf16.mxu1 %v600_v9 }
  0x47   :  { %257 = vmatpush1.bf16.msra.mxu0 %v587_v26 }
  0x48   :  { %539 = vmatpush3.bf16.msra.mxu1 %v601_v10 }
  0x49   :  { %540 = vmatprep.subr.bf16.mxu1 %v602_v11 }
  0x4c   :  { %541 = vmatpush3.bf16.msra.mxu1 %v603_v12 }
  0xa7   :  { %v85_v37 = vpop.permute.xlu1 %84 }
  0xa8   :  { %v61_v38 = vpop.permute.xlu0 %60  ;;  %v95_v56 = vmul.f32 %v94_v48, %v85_v37 }
  0xa9   :  { %v72_v44 = vmul.f32 %v71_v39, %v61_v38 }
  0xab   :  { %v89_v42 = vpop.permute.xlu1 %88  ;;  %v81_v51 = vadd.f32 %v483_v46, %v72_v44 }
  0xac   :  { %v66_v43 = vpop.permute.xlu0 %65  ;;  %v96_v52 = vmul.f32 %v94_v48, %v89_v42 }
  0xad   :  { %v73_v45 = vmul.f32 %v71_v39, %v66_v43  ;;  %v97_v60 = vadd.f32 %v95_v56, %v81_v51 }
  0xaf   :  { %v82_v49 = vadd.f32 %v483_v46, %v73_v45 }
  0xb0   :  { %v105_v53 = vpop.permute.xlu1 %104 }
  0xb1   :  { %v101_v54 = vpop.permute.xlu0 %100  ;;  %v98_v57 = vadd.f32 %v96_v52, %v82_v49  ;;  %v112_v58 = vmul.f32 %v110_v50, %v105_v53 }
  0xb2   :  { %v111_v59 = vmul.f32 %v110_v50, %v101_v54 }
  0xb3   :  { %v114_v63 = vadd.f32 %v112_v58, %v98_v57 }
  0xb4   :  { %v113_v0 = vadd.f32 %v111_v59, %v97_v60 }
  0xb5   :  { %v117_v61 = vpop.permute.xlu1 %116 }
  0xb6   :  { %v121_v62 = vpop.permute.xlu0 %120  ;;  %v127_v1 = vmul.f32 %v126_v55, %v117_v61 }
  0xb7   :  { %v128_v2 = vmul.f32 %v126_v55, %v121_v62 }
  0xb8   :  { %v129_v3 = vadd.f32 %v127_v1, %v113_v0 }
  0xb9   :  { %v130_v4 = vadd.f32 %v128_v2, %v114_v63 }
  0xba   :  { %v131_v5 = vmax.f32 %v129_v3, 0.0 }
  0xbb   :  { %v132_v6 = vmax.f32 %v130_v4, 0.0 }
  0xbd   :  { %v133_v7 = vpack.c.bf16 %v132_v6, %v131_v5 }
  0xbf   :  { %275 = vmatmul.mubr.bf16.vlgmr.msra.gmra.mrb[0].mxu0 %v133_v7 }
 0x192   :  { %v276_v16 = vpop.f32.mrb[0].mxu0 }
 0x193   :  { %v277_v17 = vadd.f32 %v276_v16, %v155_v14  ;;  %v278_v18 = vpop.f32.mrb[1].mxu0 }
 0x194   :  { %v279_v19 = vadd.f32 %v278_v18, %v159_v15  ;;  %v280_v20 = vpop.f32.mrb[2].mxu0 }
 0x195   :  { %v281_v21 = vadd.f32 %v280_v20, %v155_v14  ;;  %v282_v22 = vpop.f32.mrb[3].mxu0  ;;  %v285_v24 = vmax.f32 %v277_v17, 0.0 }
 0x196   :  { %v283_v23 = vadd.f32 %v282_v22, %v159_v15  ;;  %v286_v26 = vmax.f32 %v279_v19, 0.0 }
 0x197   :  { %v287_v25 = vmax.f32 %v281_v21, 0.0 }
 0x198   :  { %v288_v27 = vmax.f32 %v283_v23, 0.0 }
 0x199   :  { %v289_v28 = vpack.c.bf16 %v287_v25, %v285_v24 }
 0x19a   :  { %v290_v29 = vpack.c.bf16 %v288_v27, %v286_v26 }
 0x19c   :  { %458 = vmatprep.mubr.bf16.mxu1 %v290_v29 }
 0x19d   :  { %459 = vmatmul.mubr.bf16.vlgmr.msra.gmra.mrb[0].mxu1 %v289_v28 }
 0x270   :  { %v542_v30 = vpop.f32.mrb[0].mxu1 }
 0x271   :  { %v543_v31 = vpop.f32.mrb[1].mxu1 }
 0x272   :  { %v544_v32 = vadd.f32 %v543_v31, %v542_v30  ;;  %v545_v33 = vpop.f32.mrb[2].mxu1 }
 0x273   :  { %v546_v35 = vpop.f32.mrb[3].mxu1 }
 0x274   :  { %v547_v36 = vadd.f32 %v546_v35, %v545_v33  ;;  %v461_v37 = vadd.f32 %v544_v32, %v500_v34 }
 0x276   :  { %v464_v38 = vadd.f32 %v547_v36, %v500_v34 }
 0x278   :  { %v524_v39 = vpack.c.bf16 %v464_v38, %v461_v37 }
 0x27a   :  { %525 = vst [vmem:[%s754_s7] sm:$0xff] %v524_v39  }
 0x27b   :  { %481 = vsyncpa [#allocation3], 1 }
 0x27c   :  { %482 = vsyncpa [#allocation5], 1 }

</bundles_post_ra>
